<compile_context>
chip_gen: v7x
topology: tpu7x:2x2x1
jax: 0.10.0
libtpu: 0.0.40
codegen_flags: <defaults>
</compile_context>

<pallas_src>
import jax
import jax.numpy as jnp
from jax.experimental import pallas as pl
from jax.experimental.pallas import tpu as pltpu


def _round_up(n, m):
    return ((n + m - 1) // m) * m


def robustdnn_kernel(x_ref, p_ref, w1_ref, b1_ref, w2_ref, b2_ref,
                     wo_ref, bo_ref, o_ref):
    # X streamed as bf16; upcast + "+ p" in f32 (portable across v5e/v6e/v7x).
    x = x_ref[...].astype(jnp.float32) + p_ref[...]
    # Stiefel layer 1: bf16 MXU operands, f32 accumulation, f32 bias/ReLU on VPU.
    z = jnp.dot(x.astype(jnp.bfloat16), w1_ref[...],
                preferred_element_type=jnp.float32) + b1_ref[...]
    z = jnp.maximum(z, 0.0)
    # Stiefel layer 2.
    z = jnp.dot(z.astype(jnp.bfloat16), w2_ref[...],
                preferred_element_type=jnp.float32) + b2_ref[...]
    z = jnp.maximum(z, 0.0)
    # Output Linear layer (nclass padded to 128 -> unmasked lane-dense stores).
    z = jnp.dot(z.astype(jnp.bfloat16), wo_ref[...],
                preferred_element_type=jnp.float32) + bo_ref[...]
    o_ref[...] = z.astype(o_ref.dtype)


def prepare_robustdnn_params(p, w1, b1, w2, b2, w_out, b_out):
    """Pad / cast parameters ONCE (hoisted out of the per-call wrapper).

    w1:(indim,hdim)  w2:(hdim,hdim)  w_out:(hdim,nclass)  p,b*: vectors.
    Weights are stored bf16 (MXU operand dtype), biases and p stay f32.
    """
    indim, hdim = w1.shape
    nclass = w_out.shape[1]
    # X is NOT lane-padded to 128; only round indim up to the sublane quantum
    # (no-op when indim is already a multiple of 8, as here).
    indim_p = _round_up(indim, 8)
    hdim_p = _round_up(hdim, 128)
    nclass_p = _round_up(nclass, 128)

    f32, bf16 = jnp.float32, jnp.bfloat16
    pp = jnp.zeros((1, indim_p), f32).at[0, :indim].set(p.astype(f32))
    w1p = jnp.zeros((indim_p, hdim_p), bf16).at[:indim, :hdim].set(w1.astype(bf16))
    b1p = jnp.zeros((1, hdim_p), f32).at[0, :hdim].set(b1.astype(f32))
    w2p = jnp.zeros((hdim_p, hdim_p), bf16).at[:hdim, :hdim].set(w2.astype(bf16))
    b2p = jnp.zeros((1, hdim_p), f32).at[0, :hdim].set(b2.astype(f32))
    wop = jnp.zeros((hdim_p, nclass_p), bf16).at[:hdim, :nclass].set(w_out.astype(bf16))
    bop = jnp.zeros((1, nclass_p), f32).at[0, :nclass].set(b_out.astype(f32))

    return dict(p=pp, w1=w1p, b1=b1p, w2=w2p, b2=b2p, wo=wop, bo=bop,
                indim=indim, indim_p=indim_p, hdim_p=hdim_p,
                nclass=nclass, nclass_p=nclass_p)


def robustdnn_forward(x, params, *, tile_b=1024):
    """x: (B, indim) f32/bf16. params: from prepare_robustdnn_params.
    Returns (B, nclass) f32."""
    B, indim = x.shape
    assert indim == params["indim"]
    indim_p = params["indim_p"]
    hdim_p = params["hdim_p"]
    nclass = params["nclass"]
    nclass_p = params["nclass_p"]

    # ---- batch tile selection ----------------------------------------------
    b8 = _round_up(B, 8)
    tile_b = _round_up(min(tile_b, b8), 8)          # clamp only for tiny B
    # Keep >=2 grid steps when the batch allows it so both TensorCores are
    # used on v7x (harmless on v5e/v6e).
    if b8 > 8 and pl.cdiv(b8, tile_b) < 2:
        tile_b = _round_up((b8 + 1) // 2, 8)
    b_pad = _round_up(B, tile_b)
    grid = (b_pad // tile_b,)

    # ---- only per-call data prep: pad batch dim of X, stream it as bf16 -----
    xp = jnp.pad(x.astype(jnp.bfloat16),
                 ((0, b_pad - B), (0, indim_p - indim)))

    # ---- VMEM budget & cost estimate ----------------------------------------
    w_bytes = 2 * 2 * (params["w1"].size + params["w2"].size + params["wo"].size)  # bf16, double-buffered
    b_bytes = 2 * 4 * (params["p"].size + params["b1"].size + params["b2"].size + params["bo"].size)
    stream_bytes = 2 * tile_b * indim_p * 2 + 2 * tile_b * nclass_p * 4
    interm_bytes = 3 * tile_b * hdim_p * 4           # f32 intermediates / spill headroom
    footprint = w_bytes + b_bytes + stream_bytes + interm_bytes
    vmem_limit = int(min(max(2 * footprint, 8 * 2 ** 20), 64 * 2 ** 20))

    flops = 2 * b_pad * (indim_p * hdim_p + hdim_p * hdim_p + hdim_p * nclass_p)
    bytes_accessed = (xp.size * 2 + b_pad * nclass_p * 4
                      + w_bytes // 2 + b_bytes // 2)
    cost = pl.CostEstimate(flops=int(flops), transcendentals=0,
                           bytes_accessed=int(bytes_accessed))

    out = pl.pallas_call(
        robustdnn_kernel,
        out_shape=jax.ShapeDtypeStruct((b_pad, nclass_p), jnp.float32),
        grid=grid,
        in_specs=[
            # streamed activations: one batch tile per grid step (bf16)
            pl.BlockSpec((tile_b, indim_p), lambda i: (i, 0)),
            # parameters: constant index_map -> single DMA, VMEM-resident
            pl.BlockSpec((1, indim_p), lambda i: (0, 0)),
            pl.BlockSpec((indim_p, hdim_p), lambda i: (0, 0)),
            pl.BlockSpec((1, hdim_p), lambda i: (0, 0)),
            pl.BlockSpec((hdim_p, hdim_p), lambda i: (0, 0)),
            pl.BlockSpec((1, hdim_p), lambda i: (0, 0)),
            pl.BlockSpec((hdim_p, nclass_p), lambda i: (0, 0)),
            pl.BlockSpec((1, nclass_p), lambda i: (0, 0)),
        ],
        out_specs=pl.BlockSpec((tile_b, nclass_p), lambda i: (i, 0)),
        compiler_params=pltpu.CompilerParams(
            dimension_semantics=("parallel",),   # shard batch tiles across TCs on v7x
            vmem_limit_bytes=vmem_limit,
        ),
        cost_estimate=cost,
    )(xp, params["p"], params["w1"], params["b1"], params["w2"],
      params["b2"], params["wo"], params["bo"])

    # NOTE: downstream consumers could take the lane-dense (b_pad, nclass_p)
    # slab directly and fuse this slice away; kept here for exact module shape.
    return out[:B, :nclass]


# ----------------- deterministic parameter construction -----------------

def stiefel_random(key, n, p_dim):
    """Random point on the Stiefel manifold St(n, p) via QR of a Gaussian."""
    g = jax.random.normal(key, (n, p_dim), dtype=jnp.float32)
    q, r = jnp.linalg.qr(g)
    d = jnp.sign(jnp.diag(r))
    d = jnp.where(d == 0, 1.0, d)
    return q * d[None, :]


def sphere_random(key, n):
    g = jax.random.normal(key, (n,), dtype=jnp.float32)
    return g / jnp.linalg.norm(g)


def xavier_uniform(key, fan_out, fan_in):
    limit = jnp.sqrt(6.0 / (fan_in + fan_out))
    return jax.random.uniform(key, (fan_out, fan_in), dtype=jnp.float32,
                              minval=-limit, maxval=limit)


def reference_forward_f32(x, p, w1, b1, w2, b2, w_out, b_out):
    z = jnp.maximum((x + p) @ w1 + b1, 0.0)
    z = jnp.maximum(z @ w2 + b2, 0.0)
    return z @ w_out + b_out


def reference_forward_mirror(x, p, w1, b1, w2, b2, w_out, b_out):
    """Mirrors the kernel's numerics: X streamed in bf16, '+ p' in f32,
    bf16 MXU operands with f32 accumulation."""
    bf, f32 = jnp.bfloat16, jnp.float32
    xq = x.astype(bf).astype(f32)
    z = jnp.dot((xq + p).astype(bf), w1.astype(bf),
                preferred_element_type=f32) + b1
    z = jnp.maximum(z, 0.0)
    z = jnp.dot(z.astype(bf), w2.astype(bf),
                preferred_element_type=f32) + b2
    z = jnp.maximum(z, 0.0)
    return jnp.dot(z.astype(bf), w_out.astype(bf),
                   preferred_element_type=f32) + b_out


if __name__ == "__main__":
    # Small shapes consistent with the module's forward: X is (batch, indim).
    batch, indim, hdim, nclass = 8, 32, 32, 8

    key = jax.random.PRNGKey(0)
    k_x, k_w1, k_w2, k_p, k_lin, k_x2 = jax.random.split(key, 6)

    x = jax.random.normal(k_x, (batch, indim), dtype=jnp.float32)

    W1 = stiefel_random(k_w1, indim, hdim)          # (indim, hdim)
    W2 = stiefel_random(k_w2, hdim, hdim)           # (hdim, hdim)
    p = sphere_random(k_p, indim)                   # (indim,)
    b1 = jnp.zeros((hdim,), dtype=jnp.float32)
    b2 = jnp.zeros((hdim,), dtype=jnp.float32)
    lin_w = xavier_uniform(k_lin, nclass, hdim)     # torch Linear: (nclass, hdim)
    lin_b = jnp.zeros((nclass,), dtype=jnp.float32)
    w_out = lin_w.T                                 # (hdim, nclass) for x @ W

    # Hoisted one-time parameter padding / bf16 cast (reused across calls).
    params = prepare_robustdnn_params(p, W1, b1, W2, b2, w_out, lin_b)
    params = jax.tree_util.tree_map(
        lambda a: jax.block_until_ready(a) if isinstance(a, jax.Array) else a, params)

    # --- small batch (single tile, clamped tile_b) ---
    out = robustdnn_forward(x, params)
    out = jax.block_until_ready(out)
    assert out.shape == (batch, nclass)

    ref_m = reference_forward_mirror(x, p, W1, b1, W2, b2, w_out, lin_b)
    ref_f32 = reference_forward_f32(x, p, W1, b1, W2, b2, w_out, lin_b)
    assert jnp.allclose(out, ref_m, atol=2e-3, rtol=2e-3), "mismatch vs mirror reference"
    assert jnp.allclose(out, ref_f32, atol=1e-1, rtol=1e-1), "mismatch vs f32 reference"

    # --- larger, non-aligned batch with default tile_b: exercises the
    #     "keep >=2 grid steps" split (tile_b -> 104, grid=(2,)) ---
    batch2 = 200
    x2 = jax.random.normal(k_x2, (batch2, indim), dtype=jnp.float32)
    out2 = robustdnn_forward(x2, params)
    out2 = jax.block_until_ready(out2)
    assert out2.shape == (batch2, nclass)
    ref2 = reference_forward_mirror(x2, p, W1, b1, W2, b2, w_out, lin_b)
    assert jnp.allclose(out2, ref2, atol=2e-3, rtol=2e-3), "mismatch on 2-step grid"

    # --- same batch with an explicit small tile: exercises a 4-step grid
    #     plus batch padding (b_pad=256) ---
    out3 = robustdnn_forward(x2, params, tile_b=64)
    out3 = jax.block_until_ready(out3)
    assert out3.shape == (batch2, nclass)
    assert jnp.allclose(out3, ref2, atol=2e-3, rtol=2e-3), "mismatch on 4-step grid"

    print("KERNEL_OK")
</pallas_src>

<mosaic_0001>
module attributes {stable_mosaic.version = 11 : i64} {
  func.func @robustdnn_kernel(%arg0: i32, %arg1: memref<8x32xbf16, #tpu.memory_space<vmem>>, %arg2: memref<1x32xf32, #tpu.memory_space<vmem>>, %arg3: memref<32x128xbf16, #tpu.memory_space<vmem>>, %arg4: memref<1x128xf32, #tpu.memory_space<vmem>>, %arg5: memref<128x128xbf16, #tpu.memory_space<vmem>>, %arg6: memref<1x128xf32, #tpu.memory_space<vmem>>, %arg7: memref<128x128xbf16, #tpu.memory_space<vmem>>, %arg8: memref<1x128xf32, #tpu.memory_space<vmem>>, %arg9: memref<8x128xf32, #tpu.memory_space<vmem>>) attributes {dimension_semantics = [#tpu.dimension_semantics<parallel>], iteration_bounds = array<i64: 1>, scalar_prefetch = 0 : i64, scratch_operands = 0 : i64, tpu.core_type = #tpu.core_type<tc>, window_params = [{transform_indices = @transform_0, window_bounds = array<i64: 8, 32>}, {pipeline_mode = #tpu.pipeline_mode<synchronous>, transform_indices = @transform_1, window_bounds = array<i64: 1, 32>}, {pipeline_mode = #tpu.pipeline_mode<synchronous>, transform_indices = @transform_2, window_bounds = array<i64: 32, 128>}, {pipeline_mode = #tpu.pipeline_mode<synchronous>, transform_indices = @transform_3, window_bounds = array<i64: 1, 128>}, {pipeline_mode = #tpu.pipeline_mode<synchronous>, transform_indices = @transform_4, window_bounds = array<i64: 128, 128>}, {pipeline_mode = #tpu.pipeline_mode<synchronous>, transform_indices = @transform_5, window_bounds = array<i64: 1, 128>}, {pipeline_mode = #tpu.pipeline_mode<synchronous>, transform_indices = @transform_6, window_bounds = array<i64: 128, 128>}, {pipeline_mode = #tpu.pipeline_mode<synchronous>, transform_indices = @transform_7, window_bounds = array<i64: 1, 128>}, {transform_indices = @transform_8, window_bounds = array<i64: 8, 128>}]} {
    %c0 = arith.constant 0 : index
    %c0_0 = arith.constant 0 : index
    %0 = vector.load %arg1[%c0, %c0_0] : memref<8x32xbf16, #tpu.memory_space<vmem>>, vector<8x32xbf16>
    %1 = arith.extf %0 : vector<8x32xbf16> to vector<8x32xf32>
    %c0_1 = arith.constant 0 : index
    %c0_2 = arith.constant 0 : index
    %2 = vector.load %arg2[%c0_1, %c0_2] : memref<1x32xf32, #tpu.memory_space<vmem>>, vector<1x32xf32>
    %3 = vector.broadcast %2 : vector<1x32xf32> to vector<8x32xf32>
    %4 = arith.addf %1, %3 : vector<8x32xf32>
    %5 = arith.truncf %4 : vector<8x32xf32> to vector<8x32xbf16>
    %c0_3 = arith.constant 0 : index
    %c0_4 = arith.constant 0 : index
    %6 = vector.load %arg3[%c0_3, %c0_4] : memref<32x128xbf16, #tpu.memory_space<vmem>>, vector<32x128xbf16>
    %cst = arith.constant dense<0.000000e+00> : vector<8x128xf32>
    %7 = tpu.matmul %5, %6, %cst {dimension_numbers = #tpu.dot_dimension_numbers<[1], [0], [0], [1], [0, 0, 1, 1], [], []>} : vector<8x32xbf16>, vector<32x128xbf16>, vector<8x128xf32> -> vector<8x128xf32>
    %c0_5 = arith.constant 0 : index
    %c0_6 = arith.constant 0 : index
    %8 = vector.load %arg4[%c0_5, %c0_6] : memref<1x128xf32, #tpu.memory_space<vmem>>, vector<1x128xf32>
    %9 = vector.broadcast %8 : vector<1x128xf32> to vector<8x128xf32>
    %10 = arith.addf %7, %9 : vector<8x128xf32>
    %cst_7 = arith.constant 0.000000e+00 : f32
    %11 = vector.broadcast %cst_7 : f32 to vector<8x128xf32>
    %12 = arith.maximumf %10, %11 : vector<8x128xf32>
    %13 = arith.truncf %12 : vector<8x128xf32> to vector<8x128xbf16>
    %c0_8 = arith.constant 0 : index
    %c0_9 = arith.constant 0 : index
    %14 = vector.load %arg5[%c0_8, %c0_9] : memref<128x128xbf16, #tpu.memory_space<vmem>>, vector<128x128xbf16>
    %cst_10 = arith.constant dense<0.000000e+00> : vector<8x128xf32>
    %15 = tpu.matmul %13, %14, %cst_10 {dimension_numbers = #tpu.dot_dimension_numbers<[1], [0], [0], [1], [0, 0, 1, 1], [], []>} : vector<8x128xbf16>, vector<128x128xbf16>, vector<8x128xf32> -> vector<8x128xf32>
    %c0_11 = arith.constant 0 : index
    %c0_12 = arith.constant 0 : index
    %16 = vector.load %arg6[%c0_11, %c0_12] : memref<1x128xf32, #tpu.memory_space<vmem>>, vector<1x128xf32>
    %17 = vector.broadcast %16 : vector<1x128xf32> to vector<8x128xf32>
    %18 = arith.addf %15, %17 : vector<8x128xf32>
    %cst_13 = arith.constant 0.000000e+00 : f32
    %19 = vector.broadcast %cst_13 : f32 to vector<8x128xf32>
    %20 = arith.maximumf %18, %19 : vector<8x128xf32>
    %21 = arith.truncf %20 : vector<8x128xf32> to vector<8x128xbf16>
    %c0_14 = arith.constant 0 : index
    %c0_15 = arith.constant 0 : index
    %22 = vector.load %arg7[%c0_14, %c0_15] : memref<128x128xbf16, #tpu.memory_space<vmem>>, vector<128x128xbf16>
    %cst_16 = arith.constant dense<0.000000e+00> : vector<8x128xf32>
    %23 = tpu.matmul %21, %22, %cst_16 {dimension_numbers = #tpu.dot_dimension_numbers<[1], [0], [0], [1], [0, 0, 1, 1], [], []>} : vector<8x128xbf16>, vector<128x128xbf16>, vector<8x128xf32> -> vector<8x128xf32>
    %c0_17 = arith.constant 0 : index
    %c0_18 = arith.constant 0 : index
    %24 = vector.load %arg8[%c0_17, %c0_18] : memref<1x128xf32, #tpu.memory_space<vmem>>, vector<1x128xf32>
    %25 = vector.broadcast %24 : vector<1x128xf32> to vector<8x128xf32>
    %26 = arith.addf %23, %25 : vector<8x128xf32>
    %c0_19 = arith.constant 0 : index
    %c0_20 = arith.constant 0 : index
    %27 = vector.load %arg9[%c0_19, %c0_20] : memref<8x128xf32, #tpu.memory_space<vmem>>, vector<8x128xf32>
    tpu.vector_store %arg9[%c0_19, %c0_20], %26 {strides = array<i32>} : memref<8x128xf32, #tpu.memory_space<vmem>>, vector<8x128xf32>,
    return
  }
  func.func @transform_0(%arg0: i32) -> (i32, i32) {
    %c0_i32 = arith.constant 0 : i32
    %c0_i32_0 = arith.constant 0 : i32
    return %arg0, %c0_i32 : i32, i32
  }
  func.func @transform_1(%arg0: i32) -> (i32, i32) {
    %c0_i32 = arith.constant 0 : i32
    %c0_i32_0 = arith.constant 0 : i32
    %c0_i32_1 = arith.constant 0 : i32
    return %c0_i32, %c0_i32_0 : i32, i32
  }
  func.func @transform_2(%arg0: i32) -> (i32, i32) {
    %c0_i32 = arith.constant 0 : i32
    %c0_i32_0 = arith.constant 0 : i32
    %c0_i32_1 = arith.constant 0 : i32
    return %c0_i32, %c0_i32_0 : i32, i32
  }
  func.func @transform_3(%arg0: i32) -> (i32, i32) {
    %c0_i32 = arith.constant 0 : i32
    %c0_i32_0 = arith.constant 0 : i32
    %c0_i32_1 = arith.constant 0 : i32
    return %c0_i32, %c0_i32_0 : i32, i32
  }
  func.func @transform_4(%arg0: i32) -> (i32, i32) {
    %c0_i32 = arith.constant 0 : i32
    %c0_i32_0 = arith.constant 0 : i32
    %c0_i32_1 = arith.constant 0 : i32
    return %c0_i32, %c0_i32_0 : i32, i32
  }
  func.func @transform_5(%arg0: i32) -> (i32, i32) {
    %c0_i32 = arith.constant 0 : i32
    %c0_i32_0 = arith.constant 0 : i32
    %c0_i32_1 = arith.constant 0 : i32
    return %c0_i32, %c0_i32_0 : i32, i32
  }
  func.func @transform_6(%arg0: i32) -> (i32, i32) {
    %c0_i32 = arith.constant 0 : i32
    %c0_i32_0 = arith.constant 0 : i32
    %c0_i32_1 = arith.constant 0 : i32
    return %c0_i32, %c0_i32_0 : i32, i32
  }
  func.func @transform_7(%arg0: i32) -> (i32, i32) {
    %c0_i32 = arith.constant 0 : i32
    %c0_i32_0 = arith.constant 0 : i32
    %c0_i32_1 = arith.constant 0 : i32
    return %c0_i32, %c0_i32_0 : i32, i32
  }
  func.func @transform_8(%arg0: i32) -> (i32, i32) {
    %c0_i32 = arith.constant 0 : i32
    %c0_i32_0 = arith.constant 0 : i32
    return %arg0, %c0_i32 : i32, i32
  }
}

</mosaic_0001>

<bundles_post_ra>
// kernel: tpu_custom_call.1
= control target key start
LH: loop header
LB: loop body
LE: loop exit
PB: predicated region body
PF: predicated region fallthrough
CT: control target
= control target key end

     0   :  { %13 = vsyncpa [#allocation3], 0  ;;  %s802_s0 = inlined_call_operand.hbm [shape: bf16[8,32], index: 0, kind: input, shape index: {}]   ;;  %s803_s1 = inlined_call_operand.vmem [shape: f32[1,32], index: 1, kind: input, shape index: {}]   ;;  %s804_s2 = inlined_call_operand.hbm [shape: bf16[32,128], index: 2, kind: input, shape index: {}]   ;;  %s805_s3 = inlined_call_operand.vmem [shape: f32[1,128], index: 3, kind: input, shape index: {}]   ;;  %s806_s4 = inlined_call_operand.hbm [shape: bf16[128,128], index: 4, kind: input, shape index: {}]   ;;  %s807_s5 = inlined_call_operand.vmem [shape: f32[1,128], index: 5, kind: input, shape index: {}]   ;;  %s808_s6 = inlined_call_operand.hbm [shape: bf16[128,128], index: 6, kind: input, shape index: {}]   ;;  %s809_s7 = inlined_call_operand.vmem [shape: f32[1,128], index: 7, kind: input, shape index: {}]   ;;  %s810_s8 = inlined_call_operand.hbm [shape: f32[8,128], index: 8, kind: output, shape index: {}]  }
   0x1   :  { %14 = vsyncpa [#allocation6], 0 }
   0x2   :  { %15 = vsyncpa [#allocation9], 0 }
   0x3   :  { %16 = vsyncpa [#allocation4], 0  ;;  %s643_s27 = smov [#allocation5]   ;;  %s525_s9 = scalar_lea.hbm %s804_s2, 256 }
   0x4   :  { %s34_s28 = sshll.u32 %s643_s27, 4  ;;  %p526_p0 = scmp.ne.s32.totalorder %s804_s2, %s525_s9  ;;  %s35_s28 = int_to_ptr.vmem [resolvable:$true] %s34_s28 }
   0x5   :  { %p529_p1 = scmp.lt.u32.totalorder %s525_s9, %s804_s2 }
   0x7   :  { %p531_p2 = pnand %p529_p1, %p526_p0 }
   0x9   :  { %534 = shalt.err (!%p531_p2)
}
   0xa   :  { %s535_s14 = scalar_lea.vmem %s35_s28, 256  ;;  %p540_p4 = scmp.lt.s32.totalorder %s35_s28, %s35_s28 }
   0xb   :  { %p536_p3 = scmp.ne.s32.totalorder %s35_s28, %s535_s14  ;;  %p541_p5 = scmp.lt.s32.totalorder %s535_s14, %s535_s14 }
   0xd   :  { %p542_p6 = por %p541_p5, %p540_p4 }
   0xf   :  { %p543_p7 = pnand %p542_p6, %p536_p3 }
  0x11   :  { %546 = shalt.err (!%p543_p7)
}
  0x12   :  { %s644_s15 = smov 64   ;;  %s645_s16 = smov 4  }
  0x13   :  { %40 = dma.hbm_to_vmem [thread:$0]  %s804_s2, 256, %s35_s28, [#allocation6], %s644_s15, %s644_s15, %s645_s16  }
  0x14   :  { %s646_s19 = smov [#allocation2]   ;;  %s647_s21 = smov [#allocation7]  }
  0x15   :  { %s23_s20 = sshll.u32 %s646_s19, 4  ;;  %s48_s22 = sshll.u32 %s647_s21, 4  ;;  %s24_s20 = int_to_ptr.vmem [resolvable:$true] %s23_s20  ;;  %s49_s22 = int_to_ptr.vmem [resolvable:$true] %s48_s22 }
  0x16   :  { %s547_s25 = scalar_lea.hbm %s802_s0, 64 }
  0x17   :  { %p548_p8 = scmp.ne.s32.totalorder %s802_s0, %s547_s25  ;;  %p551_p9 = scmp.lt.u32.totalorder %s547_s25, %s802_s0 }
  0x19   :  { %p553_p10 = pnand %p551_p9, %p548_p8 }
  0x1b   :  { %556 = shalt.err (!%p553_p10)
}
  0x1c   :  { %s557_s2 = scalar_lea.vmem %s24_s20, 64  ;;  %p562_p12 = scmp.lt.s32.totalorder %s24_s20, %s24_s20 }
  0x1d   :  { %p558_p11 = scmp.ne.s32.totalorder %s24_s20, %s557_s2  ;;  %p563_p13 = scmp.lt.s32.totalorder %s557_s2, %s557_s2 }
  0x1f   :  { %p564_p0 = por %p563_p13, %p562_p12 }
  0x21   :  { %p565_p1 = pnand %p564_p0, %p558_p11 }
  0x23   :  { %568 = shalt.err (!%p565_p1)
}
  0x24   :  { %26 = dma.hbm_to_vmem [thread:$0]  %s802_s0, 64, %s24_s20, [#allocation3]  }
  0x25   :  { %s569_s12 = scalar_lea.hbm %s806_s4, 1024 }
  0x26   :  { %p570_p2 = scmp.ne.s32.totalorder %s806_s4, %s569_s12  ;;  %p573_p3 = scmp.lt.u32.totalorder %s569_s12, %s806_s4 }
  0x28   :  { %p575_p4 = pnand %p573_p3, %p570_p2 }
  0x2a   :  { %578 = shalt.err (!%p575_p4)
}
  0x2b   :  { %s579_s19 = scalar_lea.vmem %s49_s22, 1024  ;;  %p584_p6 = scmp.lt.s32.totalorder %s49_s22, %s49_s22 }
  0x2c   :  { %p580_p5 = scmp.ne.s32.totalorder %s49_s22, %s579_s19  ;;  %p585_p7 = scmp.lt.s32.totalorder %s579_s19, %s579_s19 }
  0x2e   :  { %p586_p8 = por %p585_p7, %p584_p6 }
  0x30   :  { %p587_p9 = pnand %p586_p8, %p580_p5 }
  0x32   :  { %590 = shalt.err (!%p587_p9)
}
  0x33   :  { %54 = dma.hbm_to_vmem [thread:$0]  %s806_s4, 1024, %s49_s22, [#allocation6], %s644_s15, %s644_s15, %s645_s16  }
  0x34   :  { %s648_s21 = smov [#allocation8]   ;;  %s591_s26 = scalar_lea.hbm %s808_s6, 1024 }
  0x35   :  { %s62_s23 = sshll.u32 %s648_s21, 4  ;;  %p592_p10 = scmp.ne.s32.totalorder %s808_s6, %s591_s26  ;;  %s63_s23 = int_to_ptr.vmem [resolvable:$true] %s62_s23 }
  0x36   :  { %p595_p11 = scmp.lt.u32.totalorder %s591_s26, %s808_s6 }
  0x38   :  { %p597_p12 = pnand %p595_p11, %p592_p10 }
  0x3a   :  { %600 = shalt.err (!%p597_p12)
}
  0x3b   :  { %s601_s28 = scalar_lea.vmem %s63_s23, 1024  ;;  %p606_p0 = scmp.lt.s32.totalorder %s63_s23, %s63_s23 }
  0x3c   :  { %p602_p13 = scmp.ne.s32.totalorder %s63_s23, %s601_s28  ;;  %p607_p1 = scmp.lt.s32.totalorder %s601_s28, %s601_s28 }
  0x3e   :  { %p608_p2 = por %p607_p1, %p606_p0 }
  0x40   :  { %p609_p3 = pnand %p608_p2, %p602_p13 }
  0x42   :  { %612 = shalt.err (!%p609_p3)
}
  0x43   :  { %68 = dma.hbm_to_vmem [thread:$0]  %s808_s6, 1024, %s63_s23, [#allocation9], %s644_s15, %s644_s15, %s645_s16  }
  0x44   :  { %635 = dma.done.wait [#allocation3], 64  }
  0x45   :  { %636 = vsyncadd [#allocation3], 4294967232 }
  0x46   :  { %637 = dma.done.wait [#allocation6], 1280  }
  0x47   :  { %638 = vsyncadd [#allocation6], 4294966016 }
  0x48   :  { %639 = dma.done.wait [#allocation9], 1024  }
  0x49   :  { %640 = vsyncadd [#allocation9], 4294966272  ;;  %v649_v0 = vmov 0.0   ;;  %vm650_vm0 = vmmov 0   ;;  %v507_v1 = vld [vmem:[#allocation5] sm:$0xff]   ;;  %v508_v2 = vld [vmem:[#allocation5 + $0x8] sm:$0xff]  }
  0x4a   :  { %450 = vmatprep.subr.bf16.mxu0 %v649_v0  ;;  %454 = vmatprep.mubr.msk.bf16.mxu0 %vm650_vm0, %v649_v0  ;;  %v84_v3 = vld [vmem:[#allocation2] sm:$0xf]  ;;  %v509_v6 = vld [vmem:[#allocation7] sm:$0xff]   ;;  %vm118_vm1 = vcmask 261120   ;;  %v511_v10 = vld [vmem:[#allocation7 + $0x10] sm:$0xff]   ;;  %s651_s12 = smov [#allocation10]  }
  0x4b   :  { %458 = vmatprep.subr.bf16.mxu1 %v649_v0  ;;  %474 = vmatprep.mubr.msk.bf16.mxu1 %vm650_vm0, %v649_v0  ;;  %v406_v4 = vld [vmem:[%s803_s1] ss:$0 sm:$0xff]  ;;  %v85_v5 = vunpack.c.l.bf16 %v84_v3  ;;  %v512_v11 = vld [vmem:[#allocation7 + $0x18] sm:$0xff]   ;;  %v513_v12 = vld [vmem:[#allocation7 + $0x20] sm:$0xff]   ;;  %s395_s13 = sshll.u32 %s651_s12, 4  ;;  %s396_s13 = int_to_ptr.vmem [resolvable:$true] %s395_s13 }
  0x4c   :  { %451 = vmatpush3.bf16.msra.mxu0 %v507_v1  ;;  %459 = vmatpush3.bf16.msra.mxu1 %v509_v6  ;;  %v510_v8 = vld [vmem:[#allocation7 + $0x8] sm:$0xff]   ;;  %v515_v14 = vld [vmem:[#allocation7 + $0x30] sm:$0xff]   ;;  %v516_v15 = vld [vmem:[#allocation7 + $0x38] sm:$0xff]   ;;  %p618_p5 = scmp.lt.s32.totalorder %s396_s13, %s396_s13 }
  0x4d   :  { %452 = vmatprep.subr.bf16.mxu0 %v649_v0  ;;  %v93_v7 = vadd.f32 %v406_v4, %v85_v5  ;;  %460 = vmatprep.subr.bf16.mxu1 %v649_v0  ;;  %v514_v13 = vld [vmem:[#allocation7 + $0x28] sm:$0xff]   ;;  %v517_v16 = vld [vmem:[#allocation8] sm:$0xff]   ;;  %v519_v18 = vld [vmem:[#allocation8 + $0x10] sm:$0xff]  }
  0x4e   :  { %v518_v17 = vld [vmem:[#allocation8 + $0x8] sm:$0xff]   ;;  %v520_v19 = vld [vmem:[#allocation8 + $0x18] sm:$0xff]   ;;  %v521_v20 = vld [vmem:[#allocation8 + $0x20] sm:$0xff]  }
  0x4f   :  { %v94_v9 = vpack.c.bf16 %v93_v7, %v93_v7  ;;  %v522_v21 = vld [vmem:[#allocation8 + $0x28] sm:$0xff]   ;;  %v523_v30 = vld [vmem:[#allocation8 + $0x30] sm:$0xff]   ;;  %v524_v31 = vld [vmem:[#allocation8 + $0x38] sm:$0xff]  }
  0x50   :  { %453 = vmatpush3.bf16.msra.mxu0 %v508_v2  ;;  %461 = vmatpush3.bf16.msra.mxu1 %v510_v8  ;;  %v407_v22 = vld [vmem:[%s805_s3] ss:$0 sm:$0xff] }
  0x51   :  { %478 = vmatprep.subr.bf16.mxu0 %v649_v0  ;;  %462 = vmatprep.subr.bf16.mxu1 %v649_v0  ;;  %v411_v32 = vld [vmem:[%s807_s5] ss:$0 sm:$0xff]  ;;  %s613_s5 = scalar_lea.vmem %s396_s13, 128 }
  0x52   :  { %v420_v40 = vld [vmem:[%s809_s7] ss:$0 sm:$0xff]  ;;  %p614_p4 = scmp.ne.s32.totalorder %s396_s13, %s613_s5  ;;  %p619_p6 = scmp.lt.s32.totalorder %s613_s5, %s613_s5 }
  0x53   :  { %455 = vmatmul.mubr.msk.bf16.vlgmr.msra.gmra.mrb[0].mxu0 %vm118_vm1, %v94_v9 }
  0x54   :  { %494 = vmatprep.mubr.msk.bf16.mxu0 %vm650_vm0, %v649_v0  ;;  %463 = vmatpush3.bf16.msra.mxu1 %v511_v10  ;;  %p620_p7 = por %p619_p6, %p618_p5 }
  0x55   :  { %464 = vmatprep.subr.bf16.mxu1 %v649_v0  ;;  %479 = vmatpush3.bf16.msra.mxu0 %v517_v16 }
  0x56   :  { %480 = vmatprep.subr.bf16.mxu0 %v649_v0  ;;  %p621_p8 = pnand %p620_p7, %p614_p4 }
  0x58   :  { %465 = vmatpush3.bf16.msra.mxu1 %v512_v11 }
  0x59   :  { %466 = vmatprep.subr.bf16.mxu1 %v649_v0  ;;  %481 = vmatpush3.bf16.msra.mxu0 %v518_v17 }
  0x5a   :  { %482 = vmatprep.subr.bf16.mxu0 %v649_v0 }
  0x5c   :  { %467 = vmatpush3.bf16.msra.mxu1 %v513_v12 }
  0x5d   :  { %468 = vmatprep.subr.bf16.mxu1 %v649_v0  ;;  %483 = vmatpush3.bf16.msra.mxu0 %v519_v18 }
  0x5e   :  { %484 = vmatprep.subr.bf16.mxu0 %v649_v0 }
  0x60   :  { %469 = vmatpush3.bf16.msra.mxu1 %v514_v13 }
  0x61   :  { %470 = vmatprep.subr.bf16.mxu1 %v649_v0  ;;  %485 = vmatpush3.bf16.msra.mxu0 %v520_v19 }
  0x62   :  { %486 = vmatprep.subr.bf16.mxu0 %v649_v0 }
  0x64   :  { %471 = vmatpush3.bf16.msra.mxu1 %v515_v14 }
  0x65   :  { %472 = vmatprep.subr.bf16.mxu1 %v649_v0  ;;  %487 = vmatpush3.bf16.msra.mxu0 %v521_v20 }
  0x66   :  { %488 = vmatprep.subr.bf16.mxu0 %v649_v0 }
  0x68   :  { %473 = vmatpush3.bf16.msra.mxu1 %v516_v15 }
  0x69   :  { %489 = vmatpush3.bf16.msra.mxu0 %v522_v21 }
  0x6a   :  { %490 = vmatprep.subr.bf16.mxu0 %v649_v0 }
  0x6d   :  { %491 = vmatpush3.bf16.msra.mxu0 %v523_v30 }
  0x6e   :  { %492 = vmatprep.subr.bf16.mxu0 %v649_v0 }
  0x71   :  { %493 = vmatpush3.bf16.msra.mxu0 %v524_v31 }
 0x126   :  { %v156_v23 = vpop.f32.mrb[0].mxu0 }
 0x127   :  { %v157_v24 = vadd.f32 %v407_v22, %v156_v23  ;;  %v456_v25 = vpop.f32.mrb[1].mxu0 }
 0x128   :  { %v159_v26 = vpop.f32.mrb[2].mxu0 }
 0x129   :  { %v162_v27 = vmax.f32 %v157_v24, 0.0  ;;  %v457_v28 = vpop.f32.mrb[3].mxu0 }
 0x12b   :  { %v163_v29 = vpack.c.bf16 %v162_v27, %v162_v27 }
 0x12d   :  { %475 = vmatmul.mubr.bf16.vlgmr.msra.gmra.mrb[0].mxu1 %v163_v29 }
 0x200   :  { %v269_v33 = vpop.f32.mrb[0].mxu1 }
 0x201   :  { %v270_v34 = vadd.f32 %v411_v32, %v269_v33  ;;  %v476_v35 = vpop.f32.mrb[1].mxu1 }
 0x202   :  { %v272_v36 = vpop.f32.mrb[2].mxu1 }
 0x203   :  { %v275_v37 = vmax.f32 %v270_v34, 0.0  ;;  %v477_v38 = vpop.f32.mrb[3].mxu1 }
 0x205   :  { %v276_v39 = vpack.c.bf16 %v275_v37, %v275_v37 }
 0x207   :  { %495 = vmatmul.mubr.bf16.vlgmr.msra.gmra.mrb[4].mxu0 %v276_v39 }
 0x2da   :  { %v382_v41 = vpop.f32.mrb[4].mxu0 }
 0x2db   :  { %v383_v42 = vadd.f32 %v420_v40, %v382_v41  ;;  %v496_v43 = vpop.f32.mrb[5].mxu0 }
 0x2dc   :  { %v385_v44 = vpop.f32.mrb[6].mxu0 }
 0x2dd   :  { %388 = vst [vmem:[#allocation10] sm:$0xff] %v383_v42  ;;  %v497_v45 = vpop.f32.mrb[7].mxu0 }
 0x2de   :  { %624 = shalt.err (!%p621_p8)
}
 0x2df   :  { %s625_s7 = scalar_lea.hbm %s810_s8, 128 }
 0x2e0   :  { %p626_p9 = scmp.ne.s32.totalorder %s810_s8, %s625_s7  ;;  %p629_p10 = scmp.lt.u32.totalorder %s625_s7, %s810_s8 }
 0x2e2   :  { %p631_p11 = pnand %p629_p10, %p626_p9 }
 0x2e4   :  { %634 = shalt.err (!%p631_p11)
}
 0x2e5   :  { %398 = dma.vmem_to_hbm [thread:$0]  %s396_s13, 128, %s810_s8, [#allocation4]  }
 0x2e6   :  { %641 = dma.done.wait [#allocation4], 128  }
 0x2e7   :  { %642 = vsyncadd [#allocation4], 4294967168 }
 0x2e8   :  { %402 = vsyncpa [#allocation3], 1 }
 0x2e9   :  { %403 = vsyncpa [#allocation6], 1 }
 0x2ea   :  { %404 = vsyncpa [#allocation9], 1 }
 0x2eb   :  { %405 = vsyncpa [#allocation4], 1 }

</bundles_post_ra>
